<compile_context>
chip_gen: v7x
topology: tpu7x:2x2x1
jax: 0.10.0
libtpu: 0.0.40
codegen_flags: <defaults>
</compile_context>

<pallas_src>
import jax
import jax.numpy as jnp
from jax import lax
from jax.experimental import pallas as pl
from jax.experimental.pallas import tpu as pltpu

_INV_SQRT2 = 0.7071067811865476

_LANE = 128
_SUBLANE = 8
_GRANULE = _LANE * _SUBLANE  # 1024 elements = one (8,128) f32 tile


def _gelu_kernel(x_ref, o_ref):
    xf = x_ref[...].astype(jnp.float32)
    # exact GELU: 0.5 * x * (1 + erf(x / sqrt(2)))  -- matches torch F.gelu default
    y = 0.5 * xf * (1.0 + lax.erf(xf * _INV_SQRT2))
    o_ref[...] = y.astype(o_ref.dtype)


def gelu_pallas(x, *, row_tile=2048):
    """Elementwise exact GELU. Works for any shape/dtype; computes in f32 in-kernel."""
    orig_shape = x.shape
    orig_dtype = x.dtype
    total = x.size

    # Pad only to the (8,128) granule (at most 1023 elements), not to a full block.
    padded_total = pl.cdiv(total, _GRANULE) * _GRANULE
    needs_pad = padded_total != total

    x_flat = jnp.ravel(x)
    if needs_pad:
        x_flat = jnp.pad(x_flat, (0, padded_total - total))

    n_rows = padded_total // _LANE        # multiple of 8 by construction
    tile = min(row_tile, n_rows)          # clamp for tiny inputs; stays a multiple of 8
    grid = (pl.cdiv(n_rows, tile),)       # ragged last block is masked by Pallas

    x2d = x_flat.reshape(n_rows, _LANE)   # lane-dense slab; contiguous reshape (no copy)

    out2d = pl.pallas_call(
        _gelu_kernel,
        out_shape=jax.ShapeDtypeStruct((n_rows, _LANE), orig_dtype),
        grid_spec=pltpu.PrefetchScalarGridSpec(
            num_scalar_prefetch=0,
            grid=grid,
            in_specs=[pl.BlockSpec((tile, _LANE), lambda i: (i, 0))],
            out_specs=pl.BlockSpec((tile, _LANE), lambda i: (i, 0)),
        ),
        compiler_params=pltpu.CompilerParams(
            # "parallel" lets the grid shard across v7x's 2 TensorCores (megacore);
            # harmless no-op on v5e/v6e.
            dimension_semantics=("parallel",),
        ),
    )(x2d)

    if needs_pad:
        # Padded tail elements are GELU(0)=0; slice them off.
        return out2d.reshape(-1)[:total].reshape(orig_shape)
    return out2d.reshape(orig_shape)


if __name__ == "__main__":
    key = jax.random.PRNGKey(0)
    # NCHW input, as the PyTorch module would typically receive.
    x = jax.random.normal(key, (2, 4, 16, 16), dtype=jnp.float32)

    y = gelu_pallas(x)
    y = jax.block_until_ready(y)

    # Reference check against JAX's exact GELU.
    y_ref = jax.nn.gelu(x, approximate=False)
    assert y.shape == x.shape and y.dtype == x.dtype
    assert jnp.allclose(y, y_ref, atol=1e-6, rtol=1e-6), "mismatch vs reference GELU"

    print("KERNEL_OK")
</pallas_src>

<mosaic_0001>
module attributes {stable_mosaic.version = 11 : i64} {
  func.func @_gelu_kernel(%arg0: i32, %arg1: memref<16x128xf32, #tpu.memory_space<vmem>>, %arg2: memref<16x128xf32, #tpu.memory_space<vmem>>) attributes {dimension_semantics = [#tpu.dimension_semantics<parallel>], iteration_bounds = array<i64: 1>, scalar_prefetch = 0 : i64, scratch_operands = 0 : i64, tpu.core_type = #tpu.core_type<tc>, window_params = [{transform_indices = @transform_0, window_bounds = array<i64: 16, 128>}, {transform_indices = @transform_1, window_bounds = array<i64: 16, 128>}]} {
    %c0 = arith.constant 0 : index
    %c0_0 = arith.constant 0 : index
    %0 = vector.load %arg1[%c0, %c0_0] : memref<16x128xf32, #tpu.memory_space<vmem>>, vector<16x128xf32>
    %cst = arith.constant 5.000000e-01 : f32
    %1 = vector.broadcast %cst : f32 to vector<16x128xf32>
    %2 = arith.mulf %1, %0 : vector<16x128xf32>
    %cst_1 = arith.constant 0.707106769 : f32
    %3 = vector.broadcast %cst_1 : f32 to vector<16x128xf32>
    %4 = arith.mulf %0, %3 : vector<16x128xf32>
    %5 = math.erf %4 : vector<16x128xf32>
    %cst_2 = arith.constant 1.000000e+00 : f32
    %6 = vector.broadcast %cst_2 : f32 to vector<16x128xf32>
    %7 = arith.addf %6, %5 : vector<16x128xf32>
    %8 = arith.mulf %2, %7 : vector<16x128xf32>
    %c0_3 = arith.constant 0 : index
    %c0_4 = arith.constant 0 : index
    %9 = vector.load %arg2[%c0_3, %c0_4] : memref<16x128xf32, #tpu.memory_space<vmem>>, vector<16x128xf32>
    tpu.vector_store %arg2[%c0_3, %c0_4], %8 {strides = array<i32>} : memref<16x128xf32, #tpu.memory_space<vmem>>, vector<16x128xf32>,
    return
  }
  func.func @transform_0(%arg0: i32) -> (i32, i32) {
    %c0_i32 = arith.constant 0 : i32
    %c0_i32_0 = arith.constant 0 : i32
    return %arg0, %c0_i32 : i32, i32
  }
  func.func @transform_1(%arg0: i32) -> (i32, i32) {
    %c0_i32 = arith.constant 0 : i32
    %c0_i32_0 = arith.constant 0 : i32
    return %arg0, %c0_i32 : i32, i32
  }
}

</mosaic_0001>

<bundles_post_ra>
// kernel: tpu_custom_call.1
= control target key start
LH: loop header
LB: loop body
LE: loop exit
PB: predicated region body
PF: predicated region fallthrough
CT: control target
= control target key end

     0   :  { %6 = vsyncpa [#allocation3], 0  ;;  %s154_s0 = inlined_call_operand.hbm [shape: f32[16,128], index: 0, kind: input, shape index: {}]   ;;  %s155_s1 = inlined_call_operand.hbm [shape: f32[16,128], index: 1, kind: output, shape index: {}]  }
   0x1   :  { %7 = vsyncpa [#allocation4], 0  ;;  %s110_s6 = smov [#allocation2]   ;;  %s62_s10 = scalar_lea.hbm %s154_s0, 256 }
   0x2   :  { %s13_s7 = sshll.u32 %s110_s6, 4  ;;  %p63_p0 = scmp.ne.s32.totalorder %s154_s0, %s62_s10  ;;  %s14_s7 = int_to_ptr.vmem [resolvable:$true] %s13_s7 }
   0x3   :  { %p66_p1 = scmp.lt.u32.totalorder %s62_s10, %s154_s0 }
   0x5   :  { %p68_p2 = pnand %p66_p1, %p63_p0 }
   0x7   :  { %71 = shalt.err (!%p68_p2)
}
   0x8   :  { %s72_s15 = scalar_lea.vmem %s14_s7, 256  ;;  %p77_p4 = scmp.lt.s32.totalorder %s14_s7, %s14_s7 }
   0x9   :  { %p73_p3 = scmp.ne.s32.totalorder %s14_s7, %s72_s15  ;;  %p78_p5 = scmp.lt.s32.totalorder %s72_s15, %s72_s15 }
   0xb   :  { %p79_p6 = por %p78_p5, %p77_p4 }
   0xd   :  { %p80_p7 = pnand %p79_p6, %p73_p3 }
   0xf   :  { %83 = shalt.err (!%p80_p7)
}
  0x10   :  { %s111_s16 = smov 128   ;;  %s112_s17 = smov 8  }
  0x11   :  { %19 = dma.hbm_to_vmem [thread:$0]  %s154_s0, 256, %s14_s7, [#allocation3], %s111_s16, %s111_s16, %s112_s17  }
  0x12   :  { %106 = dma.done.wait [#allocation3], 256  }
  0x13   :  { %107 = vsyncadd [#allocation3], 4294967040  ;;  %v23_v0 = vld [vmem:[#allocation2] sm:$0xff]  ;;  %v24_v1 = vld [vmem:[#allocation2 + $0x8] sm:$0xff]  ;;  %s113_s20 = smov [#allocation5]  }
  0x14   :  { %v27_v2 = vmul.f32 0.70710677, %v23_v0  ;;  %v28_v3 = vmul.f32 0.70710677, %v24_v1  ;;  %v25_v4 = vmul.f32 0.5, %v23_v0  ;;  %v26_v6 = vmul.f32 0.5, %v24_v1 }
  0x15   :  { %s42_s21 = sshll.u32 %s113_s20, 4  ;;  %s43_s21 = int_to_ptr.vmem [resolvable:$true] %s42_s21 }
  0x16   :  { %58 = verf.f32 %v27_v2  ;;  %s84_s0 = scalar_lea.vmem %s43_s21, 256  ;;  %p89_p9 = scmp.lt.s32.totalorder %s43_s21, %s43_s21 }
  0x17   :  { %60 = verf.f32 %v28_v3  ;;  %p85_p8 = scmp.ne.s32.totalorder %s43_s21, %s84_s0  ;;  %p90_p10 = scmp.lt.s32.totalorder %s84_s0, %s84_s0 }
  0x19   :  { %p91_p11 = por %p90_p10, %p89_p9 }
  0x1b   :  { %p92_p12 = pnand %p91_p11, %p85_p8 }
  0x20   :  { %v59_v5 = vpop.eup %58 }
  0x21   :  { %v61_v7 = vpop.eup %60  ;;  %v31_v8 = vadd.f32 1.0, %v59_v5 }
  0x22   :  { %v32_v9 = vadd.f32 1.0, %v61_v7 }
  0x23   :  { %v33_v10 = vmul.f32 %v31_v8, %v25_v4 }
  0x24   :  { %v34_v11 = vmul.f32 %v32_v9, %v26_v6 }
  0x25   :  { %35 = vst [vmem:[#allocation5] sm:$0xff] %v33_v10 }
  0x26   :  { %36 = vst [vmem:[#allocation5 + $0x8] sm:$0xff] %v34_v11 }
  0x27   :  { %95 = shalt.err (!%p92_p12)
}
  0x28   :  { %s96_s24 = scalar_lea.hbm %s155_s1, 256 }
  0x29   :  { %p97_p13 = scmp.ne.s32.totalorder %s155_s1, %s96_s24  ;;  %p100_p0 = scmp.lt.u32.totalorder %s96_s24, %s155_s1 }
  0x2b   :  { %p102_p1 = pnand %p100_p0, %p97_p13 }
  0x2d   :  { %105 = shalt.err (!%p102_p1)
}
  0x2e   :  { %48 = dma.vmem_to_hbm [thread:$0]  %s43_s21, 256, %s155_s1, [#allocation4], %s111_s16, %s111_s16, %s112_s17  }
  0x2f   :  { %108 = dma.done.wait [#allocation4], 256  }
  0x30   :  { %109 = vsyncadd [#allocation4], 4294967040 }
  0x31   :  { %52 = vsyncpa [#allocation3], 1 }
  0x32   :  { %53 = vsyncpa [#allocation4], 1 }

</bundles_post_ra>
